<compile_context>
chip_gen: v6e
topology: v6e:2x2x1
jax: 0.10.0
libtpu: 0.0.40
codegen_flags: <defaults>
</compile_context>

<pallas_src>
import functools

import jax
import jax.numpy as jnp
from jax.experimental import pallas as pl
from jax.experimental.pallas import tpu as pltpu


def _round_up(x, m):
    return (x + m - 1) // m * m


# ---------------------------------------------------------------------------
# Kernel
# ---------------------------------------------------------------------------
def mlp_kernel(x_ref, w1_ref, b1_ref, w2_ref, b2_ref, w3_ref, b3_ref,
               o_ref, acc_ref):
    """Grid = (batch tiles, hidden chunks).

    Each step of the inner ("arbitrary") axis computes one hidden chunk of
    layer 1 and accumulates its layer-2 partial product into an f32 VMEM
    scratch; the last step applies the layer-2 bias+ReLU and runs layer 3.
    """
    k = pl.program_id(1)

    @pl.when(k == 0)
    def _():
        acc_ref[...] = jnp.zeros_like(acc_ref)

    # In-kernel bf16 cast of the activation (no wrapper-side cast pass).
    x = x_ref[...].astype(jnp.bfloat16)

    # Layer 1 (this hidden chunk): bf16 MXU, f32 accumulate; bias + ReLU in
    # f32, single cast to bf16 fused with the activation.
    h1 = jnp.dot(x, w1_ref[...], preferred_element_type=jnp.float32)
    h1 = jnp.maximum(h1 + b1_ref[...], 0.0).astype(jnp.bfloat16)

    # Layer 2 partial product for this hidden chunk -> f32 accumulator.
    acc_ref[...] += jnp.dot(h1, w2_ref[...], preferred_element_type=jnp.float32)

    @pl.when(k == pl.num_programs(1) - 1)
    def _():
        h2 = jnp.maximum(acc_ref[...] + b2_ref[...], 0.0).astype(jnp.bfloat16)
        out = jnp.dot(h2, w3_ref[...], preferred_element_type=jnp.float32)
        o_ref[...] = (out + b3_ref[...]).astype(o_ref.dtype)


# ---------------------------------------------------------------------------
# Feature detection / hardware queries (one-time, probe-only guards)
# ---------------------------------------------------------------------------
@functools.lru_cache(maxsize=None)
def _pipeline_mode_supported():
    """Detect pl.Buffered(1) support with a tiny standalone probe kernel.

    Only the probe is guarded; the real kernel call is never wrapped, so
    genuine failures there still surface."""
    try:
        spec = pl.BlockSpec((8, 128), lambda i: (0, 0),
                            pipeline_mode=pl.Buffered(1))
    except (TypeError, AttributeError):
        return False

    def _probe_kernel(x_ref, o_ref):
        o_ref[...] = x_ref[...]

    try:
        probe = pl.pallas_call(
            _probe_kernel,
            out_shape=jax.ShapeDtypeStruct((8, 128), jnp.float32),
            grid=(1,),
            in_specs=[spec],
            out_specs=pl.BlockSpec((8, 128), lambda i: (0, 0)),
        )
        jax.block_until_ready(probe(jnp.zeros((8, 128), jnp.float32)))
        return True
    except Exception:
        return False


@functools.lru_cache(maxsize=None)
def _vmem_budget_bytes():
    """Generation-aware VMEM budget: ~75% of physical capacity
    (~96 MiB on v5e/v6e's 128 MiB, ~48 MiB on v7x's 64 MiB/TC)."""
    try:
        cap = pltpu.get_tpu_info().vmem_capacity_bytes
    except Exception:  # hw-info query only; conservative fallback
        cap = 64 * 1024 * 1024
    return int(cap) * 3 // 4


# ---------------------------------------------------------------------------
# One-time weight preparation (model-init time, NOT per forward call)
# ---------------------------------------------------------------------------
def prepare_mlp_params(w1, b1, w2, b2, w3, b3):
    """Pad weights/biases to lane-dense (multiple-of-128) feature dims and
    cast weights to bf16.  Zero padding is mathematically exact."""
    in_sz, hid = w1.shape
    out_sz = w3.shape[1]
    in_pad = _round_up(in_sz, 128)
    hid_pad = _round_up(hid, 128)
    out_pad = _round_up(out_sz, 128)

    def pad2(a, rows, cols):
        return jnp.pad(a, ((0, rows - a.shape[0]), (0, cols - a.shape[1])))

    return dict(
        w1=pad2(w1, in_pad, hid_pad).astype(jnp.bfloat16),
        b1=pad2(b1.astype(jnp.float32).reshape(1, -1), 1, hid_pad),
        w2=pad2(w2, hid_pad, hid_pad).astype(jnp.bfloat16),
        b2=pad2(b2.astype(jnp.float32).reshape(1, -1), 1, hid_pad),
        w3=pad2(w3, hid_pad, out_pad).astype(jnp.bfloat16),
        b3=pad2(b3.astype(jnp.float32).reshape(1, -1), 1, out_pad),
        dims=(in_sz, hid, out_sz, in_pad, hid_pad, out_pad),
    )


# ---------------------------------------------------------------------------
# Tiling heuristics
# ---------------------------------------------------------------------------
def _choose_block_b(B, hid_pad, vmem_budget):
    b8 = _round_up(B, 8)
    if b8 <= 256:
        # Small batch: weight-DMA bound.  One tile; splitting across cores
        # would duplicate the weight DMA for zero compute gain.
        block_b = b8
    else:
        # Large batch: aim for >=4 grid steps along B (so x/out DMA pipelines
        # and both v7x cores get several steps each), capped at 512 rows.
        block_b = min(512, _round_up(pl.cdiv(B, 4), 8))
    # Keep the f32 layer-2 accumulator a modest slice of the VMEM budget.
    max_rows = max(8, (vmem_budget // 4) // (hid_pad * 4) // 8 * 8)
    return max(8, min(block_b, max_rows))


def _choose_hid_chunk(in_pad, hid_pad, out_pad, block_b, vmem_budget):
    """Pick the hidden-chunk width for streaming W1/b1/W2 (multiple of 128,
    exact divisor of hid_pad so there are no ragged K blocks)."""
    fixed = (2 * block_b * in_pad * 4        # x tiles (f32, double-buffered)
             + 2 * block_b * out_pad * 4     # out tiles (double-buffered)
             + block_b * hid_pad * 4         # layer-2 f32 accumulator
             + hid_pad * out_pad * 2         # W3 (bf16, single-buffered)
             + (hid_pad + out_pad) * 4)      # b2, b3
    budget = vmem_budget - fixed
    # Double-buffered streamed tiles: W1 (in_pad x 128), b1, W2 (128 x hid_pad).
    per_128 = 2 * (in_pad * 128 * 2 + 128 * 4 + 128 * hid_pad * 2)
    n_128 = max(1, min(hid_pad // 128, budget // per_128 if budget > 0 else 1))
    chunk = int(n_128) * 128
    while hid_pad % chunk != 0:
        chunk -= 128
    return chunk


# ---------------------------------------------------------------------------
# pallas_call construction
# ---------------------------------------------------------------------------
def _build_call(B_pad, block_b, in_pad, hid_pad, out_pad, hid_chunk,
                out_dtype, vmem_limit):
    n_b = B_pad // block_b
    n_k = hid_pad // hid_chunk
    use_buffered = _pipeline_mode_supported()

    def const_spec(shape, index_map):
        # Grid-invariant tensors: one resident buffer (double-buffering a
        # constant wastes VMEM), when supported by this jax version.
        if use_buffered:
            return pl.BlockSpec(shape, index_map, pipeline_mode=pl.Buffered(1))
        return pl.BlockSpec(shape, index_map)

    # Tensors streamed over k keep default double-buffering so their DMA
    # overlaps MXU work; if there is only one k step they are constants too.
    stream_spec = const_spec if n_k == 1 else pl.BlockSpec

    in_specs = [
        pl.BlockSpec((block_b, in_pad), lambda i, k: (i, 0)),      # x
        stream_spec((in_pad, hid_chunk), lambda i, k: (0, k)),     # W1
        stream_spec((1, hid_chunk), lambda i, k: (0, k)),          # b1
        stream_spec((hid_chunk, hid_pad), lambda i, k: (k, 0)),    # W2
        const_spec((1, hid_pad), lambda i, k: (0, 0)),             # b2
        const_spec((hid_pad, out_pad), lambda i, k: (0, 0)),       # W3
        const_spec((1, out_pad), lambda i, k: (0, 0)),             # b3
    ]

    flops = 2 * B_pad * (in_pad * hid_pad + hid_pad * hid_pad
                         + hid_pad * out_pad)
    weight_bytes = ((in_pad * hid_pad + hid_pad * hid_pad
                     + hid_pad * out_pad) * 2
                    + (2 * hid_pad + out_pad) * 4)
    bytes_accessed = (B_pad * in_pad * 4                 # x (f32)
                      + B_pad * out_pad * jnp.dtype(out_dtype).itemsize
                      + weight_bytes * n_b)              # weights per batch tile

    return pl.pallas_call(
        mlp_kernel,
        out_shape=jax.ShapeDtypeStruct((B_pad, out_pad), out_dtype),
        grid_spec=pltpu.PrefetchScalarGridSpec(
            num_scalar_prefetch=0,
            grid=(n_b, n_k),
            in_specs=in_specs,
            out_specs=pl.BlockSpec((block_b, out_pad), lambda i, k: (i, 0)),
            scratch_shapes=[pltpu.VMEM((block_b, hid_pad), jnp.float32)],
        ),
        compiler_params=pltpu.CompilerParams(
            dimension_semantics=("parallel", "arbitrary"),
            vmem_limit_bytes=vmem_limit,
        ),
        cost_estimate=pl.CostEstimate(
            flops=flops, transcendentals=0, bytes_accessed=int(bytes_accessed)),
    )


# ---------------------------------------------------------------------------
# Forward wrapper
# ---------------------------------------------------------------------------
def mlp_forward(x, params, *, block_b=None, out_dtype=None):
    """x: (B, in_features) f32/bf16. `params` from prepare_mlp_params()."""
    B = x.shape[0]
    _, _, out_sz, in_pad, hid_pad, out_pad = params["dims"]
    out_dtype = x.dtype if out_dtype is None else out_dtype

    vmem_budget = _vmem_budget_bytes()
    if block_b is None:
        block_b = _choose_block_b(B, hid_pad, vmem_budget)
    block_b = _round_up(block_b, 8)
    B_pad = _round_up(B, block_b)
    hid_chunk = _choose_hid_chunk(in_pad, hid_pad, out_pad, block_b, vmem_budget)

    # Only the activation is padded per call (weights were prepared once);
    # no per-call dtype cast -- the kernel casts x to bf16 in-body.
    x_p = jnp.pad(x, ((0, B_pad - B), (0, in_pad - x.shape[1])))

    call = _build_call(B_pad, block_b, in_pad, hid_pad, out_pad, hid_chunk,
                       out_dtype, vmem_budget)
    out_full = call(x_p, params["w1"], params["b1"], params["w2"],
                    params["b2"], params["w3"], params["b3"])
    return out_full[:B, :out_sz]


# ---------------------------------------------------------------------------
# Init / demo
# ---------------------------------------------------------------------------
def init_linear(key, fan_in, fan_out, dtype=jnp.float32):
    # Mimics PyTorch's uniform(-1/sqrt(fan_in), 1/sqrt(fan_in)) init.
    kw, kb = jax.random.split(key)
    bound = float(fan_in) ** -0.5
    # Stored as (fan_in, fan_out) == transpose of PyTorch's (out, in).
    w = jax.random.uniform(kw, (fan_in, fan_out), dtype, minval=-bound, maxval=bound)
    b = jax.random.uniform(kb, (1, fan_out), dtype, minval=-bound, maxval=bound)
    return w, b


if __name__ == "__main__":
    input_size, hidden_size, output_size = 32, 64, 16
    batch = 8

    key = jax.random.PRNGKey(0)
    kx, k1, k2, k3 = jax.random.split(key, 4)

    x = jax.random.normal(kx, (batch, input_size), jnp.float32)
    w1, b1 = init_linear(k1, input_size, hidden_size)
    w2, b2 = init_linear(k2, hidden_size, hidden_size)
    w3, b3 = init_linear(k3, hidden_size, output_size)

    # One-time weight preparation (pad + bf16 cast) at model-init time.
    params = prepare_mlp_params(w1, b1, w2, b2, w3, b3)

    out = mlp_forward(x, params)
    out = jax.block_until_ready(out)
    assert out.shape == (batch, output_size)

    # Reference A: same bf16-matmul / f32-accumulate recipe as the kernel.
    xb = x.astype(jnp.bfloat16)
    h1b = jnp.maximum(
        jnp.dot(xb, w1.astype(jnp.bfloat16),
                preferred_element_type=jnp.float32) + b1, 0.0)
    h2b = jnp.maximum(
        jnp.dot(h1b.astype(jnp.bfloat16), w2.astype(jnp.bfloat16),
                preferred_element_type=jnp.float32) + b2, 0.0)
    ref_bf16 = jnp.dot(h2b.astype(jnp.bfloat16), w3.astype(jnp.bfloat16),
                       preferred_element_type=jnp.float32) + b3
    assert jnp.allclose(out, ref_bf16, atol=1e-4, rtol=1e-3), \
        "mismatch vs bf16 reference"

    # Reference B: full-f32 math (module semantics), looser tolerance since
    # the kernel uses bf16 matmul inputs.
    h1 = jnp.maximum(x @ w1 + b1, 0.0)
    h2 = jnp.maximum(h1 @ w2 + b2, 0.0)
    ref_f32 = h2 @ w3 + b3
    assert jnp.allclose(out, ref_f32, atol=5e-2, rtol=5e-2), \
        "mismatch vs f32 reference"

    print("KERNEL_OK")
</pallas_src>

<mosaic_0001>
module attributes {stable_mosaic.version = 11 : i64} {
  func.func @_probe_kernel(%arg0: i32, %arg1: memref<8x128xf32, #tpu.memory_space<vmem>>, %arg2: memref<8x128xf32, #tpu.memory_space<vmem>>) attributes {dimension_semantics = [#tpu.dimension_semantics<arbitrary>], iteration_bounds = array<i64: 1>, scalar_prefetch = 0 : i64, scratch_operands = 0 : i64, tpu.core_type = #tpu.core_type<tc>, window_params = [{pipeline_mode = #tpu.pipeline_mode<synchronous>, transform_indices = @transform_0, window_bounds = array<i64: 8, 128>}, {pipeline_mode = #tpu.pipeline_mode<synchronous>, transform_indices = @transform_1, window_bounds = array<i64: 8, 128>}]} {
    %c0 = arith.constant 0 : index
    %c0_0 = arith.constant 0 : index
    %0 = vector.load %arg1[%c0, %c0_0] : memref<8x128xf32, #tpu.memory_space<vmem>>, vector<8x128xf32>
    %c0_1 = arith.constant 0 : index
    %c0_2 = arith.constant 0 : index
    %1 = vector.load %arg2[%c0_1, %c0_2] : memref<8x128xf32, #tpu.memory_space<vmem>>, vector<8x128xf32>
    tpu.vector_store %arg2[%c0_1, %c0_2], %0 {strides = array<i32>} : memref<8x128xf32, #tpu.memory_space<vmem>>, vector<8x128xf32>,
    return
  }
  func.func @transform_0(%arg0: i32) -> (i32, i32) {
    %c0_i32 = arith.constant 0 : i32
    %c0_i32_0 = arith.constant 0 : i32
    %c0_i32_1 = arith.constant 0 : i32
    return %c0_i32, %c0_i32_0 : i32, i32
  }
  func.func @transform_1(%arg0: i32) -> (i32, i32) {
    %c0_i32 = arith.constant 0 : i32
    %c0_i32_0 = arith.constant 0 : i32
    %c0_i32_1 = arith.constant 0 : i32
    return %c0_i32, %c0_i32_0 : i32, i32
  }
}

module attributes {stable_mosaic.version = 11 : i64} {
  func.func @mlp_kernel(%arg0: i32, %arg1: i32, %arg2: memref<8x128xf32, #tpu.memory_space<vmem>>, %arg3: memref<128x128xbf16, #tpu.memory_space<vmem>>, %arg4: memref<1x128xf32, #tpu.memory_space<vmem>>, %arg5: memref<128x128xbf16, #tpu.memory_space<vmem>>, %arg6: memref<1x128xf32, #tpu.memory_space<vmem>>, %arg7: memref<128x128xbf16, #tpu.memory_space<vmem>>, %arg8: memref<1x128xf32, #tpu.memory_space<vmem>>, %arg9: memref<8x128xf32, #tpu.memory_space<vmem>>, %arg10: memref<8x128xf32, #tpu.memory_space<vmem>>) attributes {dimension_semantics = [#tpu.dimension_semantics<parallel>, #tpu.dimension_semantics<arbitrary>], iteration_bounds = array<i64: 1, 1>, scalar_prefetch = 0 : i64, scratch_operands = 1 : i64, tpu.core_type = #tpu.core_type<tc>, window_params = [{transform_indices = @transform_0, window_bounds = array<i64: 8, 128>}, {transform_indices = @transform_1, window_bounds = array<i64: 128, 128>}, {transform_indices = @transform_2, window_bounds = array<i64: 1, 128>}, {transform_indices = @transform_3, window_bounds = array<i64: 128, 128>}, {pipeline_mode = #tpu.pipeline_mode<synchronous>, transform_indices = @transform_4, window_bounds = array<i64: 1, 128>}, {pipeline_mode = #tpu.pipeline_mode<synchronous>, transform_indices = @transform_5, window_bounds = array<i64: 128, 128>}, {pipeline_mode = #tpu.pipeline_mode<synchronous>, transform_indices = @transform_6, window_bounds = array<i64: 1, 128>}, {transform_indices = @transform_7, window_bounds = array<i64: 8, 128>}]} {
    %c0_i32 = arith.constant 0 : i32
    %0 = arith.cmpi eq, %arg1, %c0_i32 : i32
    %1 = arith.extui %0 : i1 to i32
    %c0_i32_0 = arith.constant 0 : i32
    %2 = arith.cmpi ne, %1, %c0_i32_0 : i32
    scf.if %2 {
      %cst_16 = arith.constant 0.000000e+00 : f32
      %21 = vector.broadcast %cst_16 : f32 to vector<8x128xf32>
      %c0_17 = arith.constant 0 : index
      %c0_18 = arith.constant 0 : index
      %22 = vector.load %arg10[%c0_17, %c0_18] : memref<8x128xf32, #tpu.memory_space<vmem>>, vector<8x128xf32>
      tpu.vector_store %arg10[%c0_17, %c0_18], %21 {strides = array<i32>} : memref<8x128xf32, #tpu.memory_space<vmem>>, vector<8x128xf32>,
    } else {
    }
    %c0 = arith.constant 0 : index
    %c0_1 = arith.constant 0 : index
    %3 = vector.load %arg2[%c0, %c0_1] : memref<8x128xf32, #tpu.memory_space<vmem>>, vector<8x128xf32>
    %4 = arith.truncf %3 : vector<8x128xf32> to vector<8x128xbf16>
    %c0_2 = arith.constant 0 : index
    %c0_3 = arith.constant 0 : index
    %5 = vector.load %arg3[%c0_2, %c0_3] : memref<128x128xbf16, #tpu.memory_space<vmem>>, vector<128x128xbf16>
    %cst = arith.constant dense<0.000000e+00> : vector<8x128xf32>
    %6 = tpu.matmul %4, %5, %cst {dimension_numbers = #tpu.dot_dimension_numbers<[1], [0], [0], [1], [0, 0, 1, 1], [], []>} : vector<8x128xbf16>, vector<128x128xbf16>, vector<8x128xf32> -> vector<8x128xf32>
    %c0_4 = arith.constant 0 : index
    %c0_5 = arith.constant 0 : index
    %7 = vector.load %arg4[%c0_4, %c0_5] : memref<1x128xf32, #tpu.memory_space<vmem>>, vector<1x128xf32>
    %8 = vector.broadcast %7 : vector<1x128xf32> to vector<8x128xf32>
    %9 = arith.addf %6, %8 : vector<8x128xf32>
    %cst_6 = arith.constant 0.000000e+00 : f32
    %10 = vector.broadcast %cst_6 : f32 to vector<8x128xf32>
    %11 = arith.maximumf %9, %10 : vector<8x128xf32>
    %12 = arith.truncf %11 : vector<8x128xf32> to vector<8x128xbf16>
    %c0_7 = arith.constant 0 : index
    %c0_8 = arith.constant 0 : index
    %13 = vector.load %arg10[%c0_7, %c0_8] : memref<8x128xf32, #tpu.memory_space<vmem>>, vector<8x128xf32>
    %c0_9 = arith.constant 0 : index
    %c0_10 = arith.constant 0 : index
    %14 = vector.load %arg5[%c0_9, %c0_10] : memref<128x128xbf16, #tpu.memory_space<vmem>>, vector<128x128xbf16>
    %cst_11 = arith.constant dense<0.000000e+00> : vector<8x128xf32>
    %15 = tpu.matmul %12, %14, %cst_11 {dimension_numbers = #tpu.dot_dimension_numbers<[1], [0], [0], [1], [0, 0, 1, 1], [], []>} : vector<8x128xbf16>, vector<128x128xbf16>, vector<8x128xf32> -> vector<8x128xf32>
    %16 = arith.addf %13, %15 : vector<8x128xf32>
    %c0_12 = arith.constant 0 : index
    %c0_13 = arith.constant 0 : index
    %17 = vector.load %arg10[%c0_12, %c0_13] : memref<8x128xf32, #tpu.memory_space<vmem>>, vector<8x128xf32>
    tpu.vector_store %arg10[%c0_12, %c0_13], %16 {strides = array<i32>} : memref<8x128xf32, #tpu.memory_space<vmem>>, vector<8x128xf32>,
    %c0_i32_14 = arith.constant 0 : i32
    %18 = arith.cmpi eq, %arg1, %c0_i32_14 : i32
    %19 = arith.extui %18 : i1 to i32
    %c0_i32_15 = arith.constant 0 : i32
    %20 = arith.cmpi ne, %19, %c0_i32_15 : i32
    scf.if %20 {
      %c0_16 = arith.constant 0 : index
      %c0_17 = arith.constant 0 : index
      %21 = vector.load %arg10[%c0_16, %c0_17] : memref<8x128xf32, #tpu.memory_space<vmem>>, vector<8x128xf32>
      %c0_18 = arith.constant 0 : index
      %c0_19 = arith.constant 0 : index
      %22 = vector.load %arg6[%c0_18, %c0_19] : memref<1x128xf32, #tpu.memory_space<vmem>>, vector<1x128xf32>
      %23 = vector.broadcast %22 : vector<1x128xf32> to vector<8x128xf32>
      %24 = arith.addf %21, %23 : vector<8x128xf32>
      %cst_20 = arith.constant 0.000000e+00 : f32
      %25 = vector.broadcast %cst_20 : f32 to vector<8x128xf32>
      %26 = arith.maximumf %24, %25 : vector<8x128xf32>
      %27 = arith.truncf %26 : vector<8x128xf32> to vector<8x128xbf16>
      %c0_21 = arith.constant 0 : index
      %c0_22 = arith.constant 0 : index
      %28 = vector.load %arg7[%c0_21, %c0_22] : memref<128x128xbf16, #tpu.memory_space<vmem>>, vector<128x128xbf16>
      %cst_23 = arith.constant dense<0.000000e+00> : vector<8x128xf32>
      %29 = tpu.matmul %27, %28, %cst_23 {dimension_numbers = #tpu.dot_dimension_numbers<[1], [0], [0], [1], [0, 0, 1, 1], [], []>} : vector<8x128xbf16>, vector<128x128xbf16>, vector<8x128xf32> -> vector<8x128xf32>
      %c0_24 = arith.constant 0 : index
      %c0_25 = arith.constant 0 : index
      %30 = vector.load %arg8[%c0_24, %c0_25] : memref<1x128xf32, #tpu.memory_space<vmem>>, vector<1x128xf32>
      %31 = vector.broadcast %30 : vector<1x128xf32> to vector<8x128xf32>
      %32 = arith.addf %29, %31 : vector<8x128xf32>
      %c0_26 = arith.constant 0 : index
      %c0_27 = arith.constant 0 : index
      %33 = vector.load %arg9[%c0_26, %c0_27] : memref<8x128xf32, #tpu.memory_space<vmem>>, vector<8x128xf32>
      tpu.vector_store %arg9[%c0_26, %c0_27], %32 {strides = array<i32>} : memref<8x128xf32, #tpu.memory_space<vmem>>, vector<8x128xf32>,
    } else {
    }
    return
  }
  func.func @transform_0(%arg0: i32, %arg1: i32) -> (i32, i32) {
    %c0_i32 = arith.constant 0 : i32
    %c0_i32_0 = arith.constant 0 : i32
    return %arg0, %c0_i32 : i32, i32
  }
  func.func @transform_1(%arg0: i32, %arg1: i32) -> (i32, i32) {
    %c0_i32 = arith.constant 0 : i32
    %c0_i32_0 = arith.constant 0 : i32
    return %c0_i32, %arg1 : i32, i32
  }
  func.func @transform_2(%arg0: i32, %arg1: i32) -> (i32, i32) {
    %c0_i32 = arith.constant 0 : i32
    %c0_i32_0 = arith.constant 0 : i32
    return %c0_i32, %arg1 : i32, i32
  }
  func.func @transform_3(%arg0: i32, %arg1: i32) -> (i32, i32) {
    %c0_i32 = arith.constant 0 : i32
    %c0_i32_0 = arith.constant 0 : i32
    return %arg1, %c0_i32 : i32, i32
  }
  func.func @transform_4(%arg0: i32, %arg1: i32) -> (i32, i32) {
    %c0_i32 = arith.constant 0 : i32
    %c0_i32_0 = arith.constant 0 : i32
    %c0_i32_1 = arith.constant 0 : i32
    return %c0_i32, %c0_i32_0 : i32, i32
  }
  func.func @transform_5(%arg0: i32, %arg1: i32) -> (i32, i32) {
    %c0_i32 = arith.constant 0 : i32
    %c0_i32_0 = arith.constant 0 : i32
    %c0_i32_1 = arith.constant 0 : i32
    return %c0_i32, %c0_i32_0 : i32, i32
  }
  func.func @transform_6(%arg0: i32, %arg1: i32) -> (i32, i32) {
    %c0_i32 = arith.constant 0 : i32
    %c0_i32_0 = arith.constant 0 : i32
    %c0_i32_1 = arith.constant 0 : i32
    return %c0_i32, %c0_i32_0 : i32, i32
  }
  func.func @transform_7(%arg0: i32, %arg1: i32) -> (i32, i32) {
    %c0_i32 = arith.constant 0 : i32
    %c0_i32_0 = arith.constant 0 : i32
    return %arg0, %c0_i32 : i32, i32
  }
}

</mosaic_0001>

<bundles_post_ra>
// kernel: tpu_custom_call.1
= control target key start
LH: loop header
LB: loop body
LE: loop exit
PB: predicated region body
PF: predicated region fallthrough
CT: control target
= control target key end

     0   :  { %6 = vsyncpa [#allocation3], 0  ;;  %s102_s0 = inlined_call_operand.hbm [shape: f32[8,128], index: 0, kind: input, shape index: {}]   ;;  %s103_s1 = inlined_call_operand.hbm [shape: f32[8,128], index: 1, kind: output, shape index: {}]  }
   0x1   :  { %7 = vsyncpa [#allocation4], 0  ;;  %s84_s6 = smov [#allocation2]  }
   0x2   :  { %s14_s7 = sshll.u32 %s84_s6, 4  ;;  %s15_s7 = int_to_ptr.vmem [resolvable:$true] %s14_s7 }
   0x3   :  { %s48_s8 = scalar_lea.vmem %s15_s7, 128  ;;  %p53_p1 = scmp.lt.s32.totalorder %s15_s7, %s15_s7 }
   0x4   :  { %p49_p0 = scmp.ne.s32.totalorder %s15_s7, %s48_s8  ;;  %p54_p2 = scmp.lt.s32.totalorder %s48_s8, %s48_s8 }
   0x6   :  { %p55_p3 = por %p54_p2, %p53_p1 }
   0x8   :  { %p56_p4 = pnand %p55_p3, %p49_p0 }
   0xa   :  { %59 = shalt.err (!%p56_p4)
}
   0xb   :  { %17 = dma.hbm_to_vmem [thread:$0]  %s102_s0, 128, %s15_s7, [#allocation3]  }
   0xc   :  { %80 = dma.done.wait [#allocation3], 128  }
   0xd   :  { %81 = vsyncadd [#allocation3], 4294967168  ;;  %s85_s11 = smov [#allocation5]   ;;  %v21_v0 = vld [vmem:[#allocation2] sm:$0xff] }
   0xe   :  { %s29_s12 = sshll.u32 %s85_s11, 4  ;;  %22 = vst [vmem:[#allocation5] sm:$0xff] %v21_v0  ;;  %s30_s12 = int_to_ptr.vmem [resolvable:$true] %s29_s12 }
   0xf   :  { %s60_s13 = scalar_lea.vmem %s30_s12, 128  ;;  %p65_p6 = scmp.lt.s32.totalorder %s30_s12, %s30_s12 }
  0x10   :  { %p61_p5 = scmp.ne.s32.totalorder %s30_s12, %s60_s13  ;;  %p66_p7 = scmp.lt.s32.totalorder %s60_s13, %s60_s13 }
  0x12   :  { %p67_p8 = por %p66_p7, %p65_p6 }
  0x14   :  { %p68_p9 = pnand %p67_p8, %p61_p5 }
  0x16   :  { %71 = shalt.err (!%p68_p9)
}
  0x17   :  { %32 = dma.vmem_to_hbm [thread:$0]  %s30_s12, 128, %s103_s1, [#allocation4]  }
  0x18   :  { %82 = dma.done.wait [#allocation4], 128  }
  0x19   :  { %83 = vsyncadd [#allocation4], 4294967168 }
  0x1a   :  { %36 = vsyncpa [#allocation3], 1 }
  0x1b   :  { %37 = vsyncpa [#allocation4], 1 }

// kernel: tpu_custom_call.1
= control target key start
LH: loop header
LB: loop body
LE: loop exit
PB: predicated region body
PF: predicated region fallthrough
CT: control target
= control target key end

     0   :  { %12 = vsyncpa [#allocation4], 0  ;;  %s818_s0 = inlined_call_operand.hbm [shape: f32[8,128], index: 0, kind: input, shape index: {}]   ;;  %s819_s1 = inlined_call_operand.hbm [shape: bf16[128,128], index: 1, kind: input, shape index: {}]   ;;  %s820_s2 = inlined_call_operand.vmem [shape: f32[1,128], index: 2, kind: input, shape index: {}]   ;;  %s821_s3 = inlined_call_operand.hbm [shape: bf16[128,128], index: 3, kind: input, shape index: {}]   ;;  %s822_s4 = inlined_call_operand.vmem [shape: f32[1,128], index: 4, kind: input, shape index: {}]   ;;  %s823_s5 = inlined_call_operand.hbm [shape: bf16[128,128], index: 5, kind: input, shape index: {}]   ;;  %s824_s6 = inlined_call_operand.vmem [shape: f32[1,128], index: 6, kind: input, shape index: {}]   ;;  %s825_s7 = inlined_call_operand.hbm [shape: f32[8,128], index: 7, kind: output, shape index: {}]  }
   0x1   :  { %13 = vsyncpa [#allocation7], 0 }
   0x2   :  { %14 = vsyncpa [#allocation10], 0 }
   0x3   :  { %15 = vsyncpa [#allocation5], 0  ;;  %s706_s24 = smov [#allocation6]  }
   0x4   :  { %s31_s25 = sshll.u32 %s706_s24, 4  ;;  %s32_s25 = int_to_ptr.vmem [resolvable:$true] %s31_s25 }
   0x5   :  { %s606_s26 = scalar_lea.vmem %s32_s25, 1024  ;;  %p611_p1 = scmp.lt.s32.totalorder %s32_s25, %s32_s25 }
   0x6   :  { %p607_p0 = scmp.ne.s32.totalorder %s32_s25, %s606_s26  ;;  %p612_p2 = scmp.lt.s32.totalorder %s606_s26, %s606_s26 }
   0x8   :  { %p613_p3 = por %p612_p2, %p611_p1 }
   0xa   :  { %p614_p4 = pnand %p613_p3, %p607_p0 }
   0xc   :  { %617 = shalt.err (!%p614_p4)
}
   0xd   :  { %s707_s27 = smov 64   ;;  %s708_s28 = smov 4  }
   0xe   :  { %37 = dma.hbm_to_vmem [thread:$0]  %s819_s1, 1024, %s32_s25, [#allocation7], %s707_s27, %s707_s27, %s708_s28  }
   0xf   :  { %s709_s8 = smov [#allocation3]   ;;  %s710_s10 = smov [#allocation8]  }
  0x10   :  { %s22_s9 = sshll.u32 %s709_s8, 4  ;;  %s45_s11 = sshll.u32 %s710_s10, 4  ;;  %s23_s9 = int_to_ptr.vmem [resolvable:$true] %s22_s9  ;;  %s46_s11 = int_to_ptr.vmem [resolvable:$true] %s45_s11 }
  0x11   :  { %s626_s12 = scalar_lea.vmem %s23_s9, 128  ;;  %p631_p6 = scmp.lt.s32.totalorder %s23_s9, %s23_s9 }
  0x12   :  { %p627_p5 = scmp.ne.s32.totalorder %s23_s9, %s626_s12  ;;  %p632_p7 = scmp.lt.s32.totalorder %s626_s12, %s626_s12 }
  0x14   :  { %p633_p8 = por %p632_p7, %p631_p6 }
  0x16   :  { %p634_p9 = pnand %p633_p8, %p627_p5 }
  0x18   :  { %637 = shalt.err (!%p634_p9)
}
  0x19   :  { %25 = dma.hbm_to_vmem [thread:$0]  %s818_s0, 128, %s23_s9, [#allocation4]  }
  0x1a   :  { %s646_s15 = scalar_lea.vmem %s46_s11, 1024  ;;  %p651_p11 = scmp.lt.s32.totalorder %s46_s11, %s46_s11 }
  0x1b   :  { %p647_p10 = scmp.ne.s32.totalorder %s46_s11, %s646_s15  ;;  %p652_p12 = scmp.lt.s32.totalorder %s646_s15, %s646_s15 }
  0x1d   :  { %p653_p13 = por %p652_p12, %p651_p11 }
  0x1f   :  { %p654_p0 = pnand %p653_p13, %p647_p10 }
  0x21   :  { %657 = shalt.err (!%p654_p0)
}
  0x22   :  { %51 = dma.hbm_to_vmem [thread:$0]  %s821_s3, 1024, %s46_s11, [#allocation7], %s707_s27, %s707_s27, %s708_s28  }
  0x23   :  { %s711_s17 = smov [#allocation9]  }
  0x24   :  { %s59_s18 = sshll.u32 %s711_s17, 4  ;;  %s60_s18 = int_to_ptr.vmem [resolvable:$true] %s59_s18 }
  0x25   :  { %s666_s19 = scalar_lea.vmem %s60_s18, 1024  ;;  %p671_p2 = scmp.lt.s32.totalorder %s60_s18, %s60_s18 }
  0x26   :  { %p667_p1 = scmp.ne.s32.totalorder %s60_s18, %s666_s19  ;;  %p672_p3 = scmp.lt.s32.totalorder %s666_s19, %s666_s19 }
  0x28   :  { %p673_p4 = por %p672_p3, %p671_p2 }
  0x2a   :  { %p674_p5 = pnand %p673_p4, %p667_p1 }
  0x2c   :  { %677 = shalt.err (!%p674_p5)
}
  0x2d   :  { %65 = dma.hbm_to_vmem [thread:$0]  %s823_s5, 1024, %s60_s18, [#allocation10], %s707_s27, %s707_s27, %s708_s28  }
  0x2e   :  { %698 = dma.done.wait [#allocation4], 128  }
  0x2f   :  { %699 = vsyncadd [#allocation4], 4294967168 }
  0x30   :  { %700 = dma.done.wait [#allocation7], 2048  }
  0x31   :  { %701 = vsyncadd [#allocation7], 4294965248 }
  0x32   :  { %702 = dma.done.wait [#allocation10], 1024  }
  0x33   :  { %703 = vsyncadd [#allocation10], 4294966272  ;;  %v712_v0 = vmov 0.0   ;;  %vm713_vm0 = vmmov 0   ;;  %v574_v1 = vld [vmem:[#allocation6 + $0x38] sm:$0xff]   ;;  %v575_v2 = vld [vmem:[#allocation6 + $0x30] sm:$0xff]  }
  0x34   :  { %505 = vmatprep.subr.bf16.mxu0 %v712_v0  ;;  %521 = vmatprep.mubr.msk.bf16.mxu0 %vm713_vm0, %v712_v0  ;;  %v576_v3 = vld [vmem:[#allocation6 + $0x28] sm:$0xff]   ;;  %v582_v4 = vld [vmem:[#allocation8 + $0x38] sm:$0xff]   ;;  %v577_v5 = vld [vmem:[#allocation6 + $0x20] sm:$0xff]   ;;  %s714_s24 = smov [#allocation11]  }
  0x35   :  { %525 = vmatprep.subr.bf16.mxu1 %v712_v0  ;;  %541 = vmatprep.mubr.msk.bf16.mxu1 %vm713_vm0, %v712_v0  ;;  %v583_v6 = vld [vmem:[#allocation8 + $0x30] sm:$0xff]   ;;  %v578_v7 = vld [vmem:[#allocation6 + $0x18] sm:$0xff]   ;;  %v584_v8 = vld [vmem:[#allocation8 + $0x28] sm:$0xff]   ;;  %s440_s25 = sshll.u32 %s714_s24, 4  ;;  %s441_s25 = int_to_ptr.vmem [resolvable:$true] %s440_s25 }
  0x36   :  { %506 = vmatpush3.bf16.msra.mxu0 %v574_v1  ;;  %526 = vmatpush3.bf16.msra.mxu1 %v582_v4  ;;  %v579_v9 = vld [vmem:[#allocation6 + $0x10] sm:$0xff]   ;;  %v585_v10 = vld [vmem:[#allocation8 + $0x20] sm:$0xff]   ;;  %v580_v11 = vld [vmem:[#allocation6 + $0x8] sm:$0xff]   ;;  %p683_p7 = scmp.lt.s32.totalorder %s441_s25, %s441_s25 }
  0x37   :  { %507 = vmatprep.subr.bf16.mxu0 %v712_v0  ;;  %527 = vmatprep.subr.bf16.mxu1 %v712_v0  ;;  %v586_v12 = vld [vmem:[#allocation8 + $0x18] sm:$0xff]   ;;  %v581_v13 = vld [vmem:[#allocation6] sm:$0xff]   ;;  %v587_v15 = vld [vmem:[#allocation8 + $0x10] sm:$0xff]  }
  0x38   :  { %v86_v14 = vld [vmem:[#allocation3] sm:$0xff]  ;;  %v588_v17 = vld [vmem:[#allocation8 + $0x8] sm:$0xff]   ;;  %v589_v18 = vld [vmem:[#allocation8] sm:$0xff]  }
  0x39   :  { %v87_v16 = vpack.c.bf16 %v86_v14, %v86_v14  ;;  %v590_v19 = vld [vmem:[#allocation9 + $0x38] sm:$0xff]   ;;  %v591_v20 = vld [vmem:[#allocation9 + $0x30] sm:$0xff]   ;;  %v592_v21 = vld [vmem:[#allocation9 + $0x28] sm:$0xff]  }
  0x3a   :  { %508 = vmatpush3.bf16.msra.mxu0 %v575_v2  ;;  %528 = vmatpush3.bf16.msra.mxu1 %v583_v6  ;;  %v593_v22 = vld [vmem:[#allocation9 + $0x20] sm:$0xff]   ;;  %v594_v23 = vld [vmem:[#allocation9 + $0x18] sm:$0xff]   ;;  %v595_v24 = vld [vmem:[#allocation9 + $0x10] sm:$0xff]  }
  0x3b   :  { %509 = vmatprep.subr.bf16.mxu0 %v712_v0  ;;  %529 = vmatprep.subr.bf16.mxu1 %v712_v0  ;;  %v451_v25 = vld [vmem:[%s820_s2] ss:$0 sm:$0xff]  ;;  %v596_v33 = vld [vmem:[#allocation9 + $0x8] sm:$0xff]   ;;  %v597_v34 = vld [vmem:[#allocation9] sm:$0xff]  }
  0x3c   :  { %v468_v35 = vld [vmem:[%s822_s4] ss:$0 sm:$0xff]  ;;  %s678_s4 = scalar_lea.vmem %s441_s25, 128 }
  0x3d   :  { %v469_v43 = vld [vmem:[%s824_s6] ss:$0 sm:$0xff]  ;;  %p679_p6 = scmp.ne.s32.totalorder %s441_s25, %s678_s4  ;;  %p684_p8 = scmp.lt.s32.totalorder %s678_s4, %s678_s4 }
  0x3e   :  { %510 = vmatpush3.bf16.msra.mxu0 %v576_v3  ;;  %530 = vmatpush3.bf16.msra.mxu1 %v584_v8 }
  0x3f   :  { %511 = vmatprep.subr.bf16.mxu0 %v712_v0  ;;  %531 = vmatprep.subr.bf16.mxu1 %v712_v0  ;;  %p685_p9 = por %p684_p8, %p683_p7 }
  0x41   :  { %p686_p10 = pnand %p685_p9, %p679_p6 }
  0x42   :  { %512 = vmatpush3.bf16.msra.mxu0 %v577_v5  ;;  %532 = vmatpush3.bf16.msra.mxu1 %v585_v10 }
  0x43   :  { %513 = vmatprep.subr.bf16.mxu0 %v712_v0  ;;  %533 = vmatprep.subr.bf16.mxu1 %v712_v0 }
  0x46   :  { %514 = vmatpush3.bf16.msra.mxu0 %v578_v7  ;;  %534 = vmatpush3.bf16.msra.mxu1 %v586_v12 }
  0x47   :  { %515 = vmatprep.subr.bf16.mxu0 %v712_v0  ;;  %535 = vmatprep.subr.bf16.mxu1 %v712_v0 }
  0x4a   :  { %516 = vmatpush3.bf16.msra.mxu0 %v579_v9  ;;  %536 = vmatpush3.bf16.msra.mxu1 %v587_v15 }
  0x4b   :  { %517 = vmatprep.subr.bf16.mxu0 %v712_v0  ;;  %537 = vmatprep.subr.bf16.mxu1 %v712_v0 }
  0x4e   :  { %518 = vmatpush3.bf16.msra.mxu0 %v580_v11  ;;  %538 = vmatpush3.bf16.msra.mxu1 %v588_v17 }
  0x4f   :  { %519 = vmatprep.subr.bf16.mxu0 %v712_v0  ;;  %539 = vmatprep.subr.bf16.mxu1 %v712_v0 }
  0x52   :  { %520 = vmatpush3.bf16.msra.mxu0 %v581_v13  ;;  %540 = vmatpush3.bf16.msra.mxu1 %v589_v18 }
  0x53   :  { %545 = vmatprep.subr.bf16.mxu0 %v712_v0 }
  0x55   :  { %522 = vmatmul.mubr.bf16.vlgmr.msra.gmra.mxu0 %v87_v16 }
  0x56   :  { %561 = vmatprep.mubr.msk.bf16.mxu0 %vm713_vm0, %v712_v0  ;;  %546 = vmatpush3.bf16.msra.mxu0 %v590_v19 }
  0x57   :  { %547 = vmatprep.subr.bf16.mxu0 %v712_v0 }
  0x5a   :  { %548 = vmatpush3.bf16.msra.mxu0 %v591_v20 }
  0x5b   :  { %549 = vmatprep.subr.bf16.mxu0 %v712_v0 }
  0x5e   :  { %550 = vmatpush3.bf16.msra.mxu0 %v592_v21 }
  0x5f   :  { %551 = vmatprep.subr.bf16.mxu0 %v712_v0 }
  0x62   :  { %552 = vmatpush3.bf16.msra.mxu0 %v593_v22 }
  0x63   :  { %553 = vmatprep.subr.bf16.mxu0 %v712_v0 }
  0x66   :  { %554 = vmatpush3.bf16.msra.mxu0 %v594_v23 }
  0x67   :  { %555 = vmatprep.subr.bf16.mxu0 %v712_v0 }
  0x6a   :  { %556 = vmatpush3.bf16.msra.mxu0 %v595_v24 }
  0x6b   :  { %557 = vmatprep.subr.bf16.mxu0 %v712_v0 }
  0x6e   :  { %558 = vmatpush3.bf16.msra.mxu0 %v596_v33 }
  0x6f   :  { %559 = vmatprep.subr.bf16.mxu0 %v712_v0 }
  0x72   :  { %560 = vmatpush3.bf16.msra.mxu0 %v597_v34 }
 0x115   :  { %v193_v26 = vpop.f32.mrf.mxu0 }
 0x116   :  { %v194_v27 = vadd.f32 %v451_v25, %v193_v26 }
 0x117   :  { %v523_v28 = vpop.f32.mrf.mxu0 }
 0x118   :  { %v199_v29 = vmax.f32 %v194_v27, 0.0 }
 0x119   :  { %v196_v30 = vpop.f32.mrf.mxu0 }
 0x11a   :  { %v200_v31 = vpack.c.bf16 %v199_v29, %v199_v29 }
 0x11b   :  { %v524_v32 = vpop.f32.mrf.mxu0 }
 0x11c   :  { %542 = vmatmul.mubr.bf16.vlgmr.msra.gmra.mxu1 %v200_v31 }
 0x1dc   :  { %v300_v36 = vpop.f32.mrf.mxu1 }
 0x1dd   :  { %v319_v37 = vadd.f32 %v468_v35, %v300_v36 }
 0x1de   :  { %v543_v38 = vpop.f32.mrf.mxu1 }
 0x1df   :  { %v320_v39 = vmax.f32 %v319_v37, 0.0 }
 0x1e0   :  { %v303_v40 = vpop.f32.mrf.mxu1 }
 0x1e1   :  { %v321_v41 = vpack.c.bf16 %v320_v39, %v320_v39 }
 0x1e2   :  { %v544_v42 = vpop.f32.mrf.mxu1 }
 0x1e3   :  { %562 = vmatmul.mubr.bf16.vlgmr.msra.gmra.mxu0 %v321_v41 }
 0x2a3   :  { %v427_v44 = vpop.f32.mrf.mxu0 }
 0x2a4   :  { %v428_v45 = vadd.f32 %v469_v43, %v427_v44 }
 0x2a5   :  { %v563_v46 = vpop.f32.mrf.mxu0 }
 0x2a6   :  { %433 = vst [vmem:[#allocation11] sm:$0xff] %v428_v45 }
 0x2a7   :  { %v430_v47 = vpop.f32.mrf.mxu0 }
 0x2a8   :  { %689 = shalt.err (!%p686_p10)
}
 0x2a9   :  { %443 = dma.vmem_to_hbm [thread:$0]  %s441_s25, 128, %s825_s7, [#allocation5]   ;;  %v564_v48 = vpop.f32.mrf.mxu0 }
 0x2aa   :  { %704 = dma.done.wait [#allocation5], 128  }
 0x2ab   :  { %705 = vsyncadd [#allocation5], 4294967168 }
 0x2ac   :  { %447 = vsyncpa [#allocation4], 1 }
 0x2ad   :  { %448 = vsyncpa [#allocation7], 1 }
 0x2ae   :  { %449 = vsyncpa [#allocation10], 1 }
 0x2af   :  { %450 = vsyncpa [#allocation5], 1 }

</bundles_post_ra>
